<compile_context>
chip_gen: v7x
topology: tpu7x:2x2x1
jax: 0.10.0
libtpu: 0.0.40
codegen_flags: <defaults>
</compile_context>

<pallas_src>
import jax
import jax.numpy as jnp
from jax.experimental import pallas as pl
from jax.experimental.pallas import tpu as pltpu

_SUBLANE = 8  # f32 sublane width (second-to-last dim granularity)


def _linear_kernel(x_ref, wt_ref, b_ref, o_ref):
    # x_ref:  (TB, D)  batch tile of the input
    # wt_ref: (D, C)   pre-transposed weight, resident across grid steps
    # b_ref:  (1, C)   bias row, resident
    # o_ref:  (TB, C)  unpadded output tile (no write amplification)
    acc = jnp.dot(
        x_ref[...],
        wt_ref[...],
        preferred_element_type=jnp.float32,
        precision=jax.lax.Precision.HIGHEST,
    )
    o_ref[...] = (acc + b_ref[...]).astype(o_ref.dtype)


def _round_up(v, m):
    return pl.cdiv(v, m) * m


def make_classifier_forward(weight, bias, *, block_b=8192):
    """Precompute (transpose/reshape) parameters once; return a jitted forward(x)."""
    C, D = weight.shape
    wt = jnp.asarray(weight).T               # (D, C) — hoisted out of the hot path
    b2 = jnp.asarray(bias).reshape(1, C)     # (1, C)

    @jax.jit
    def forward(x):
        B, D_in = x.shape
        assert D_in == D, "in_features mismatch"

        # Balanced batch tile: multiple of 8, capped at block_b, sized so the
        # last (ragged) tile isn't mostly padding for awkward B.
        n_steps = pl.cdiv(B, block_b)
        TB = min(_round_up(pl.cdiv(B, n_steps), _SUBLANE), block_b)
        grid = (pl.cdiv(B, TB),)  # ragged tail handled by the block machinery

        return pl.pallas_call(
            _linear_kernel,
            out_shape=jax.ShapeDtypeStruct((B, C), x.dtype),
            grid_spec=pl.GridSpec(
                grid=grid,
                in_specs=[
                    pl.BlockSpec((TB, D), lambda i: (i, 0)),   # x batch tile
                    pl.BlockSpec((D, C), lambda i: (0, 0)),    # weight (resident)
                    pl.BlockSpec((1, C), lambda i: (0, 0)),    # bias (resident)
                ],
                out_specs=pl.BlockSpec((TB, C), lambda i: (i, 0)),
            ),
            compiler_params=pltpu.CompilerParams(
                dimension_semantics=("parallel",),   # shard batch tiles across TCs
                vmem_limit_bytes=32 * 1024 * 1024,   # safe on v5e/v6e/v7x; ~16 MiB used
            ),
            cost_estimate=pl.CostEstimate(
                flops=2 * B * D * C,
                transcendentals=0,
                bytes_accessed=4 * (B * D + D * C + C + B * C),
            ),
        )(x, wt, b2)

    return forward


def classifier_forward(x, weight, bias, *, block_b=8192):
    """One-shot convenience wrapper (prefer make_classifier_forward for reuse)."""
    return make_classifier_forward(weight, bias, block_b=block_b)(x)


if __name__ == "__main__":
    num_cls = 10
    in_features = 64
    batch = 8

    # Deterministic parameter init matching the PyTorch module's __init__:
    #   weight = torch.ones(num_cls, 64), bias = torch.zeros(num_cls)
    weight = jnp.ones((num_cls, in_features), dtype=jnp.float32)
    bias = jnp.zeros((num_cls,), dtype=jnp.float32)

    key = jax.random.PRNGKey(0)
    x = jax.random.normal(key, (batch, in_features), dtype=jnp.float32)

    forward = make_classifier_forward(weight, bias)
    out = jax.block_until_ready(forward(x))

    ref = x @ weight.T + bias[None, :]
    assert out.shape == (batch, num_cls)
    assert jnp.allclose(out, ref, atol=1e-5, rtol=1e-5)

    # Extra sanity check: multi-tile grid with a ragged last batch tile.
    x2 = jax.random.normal(jax.random.PRNGKey(1), (200, in_features), dtype=jnp.float32)
    out2 = jax.block_until_ready(classifier_forward(x2, weight, bias, block_b=64))
    ref2 = x2 @ weight.T + bias[None, :]
    assert out2.shape == (200, num_cls)
    assert jnp.allclose(out2, ref2, atol=1e-5, rtol=1e-5)

    print("KERNEL_OK")
</pallas_src>

<mosaic_0001>
module attributes {stable_mosaic.version = 11 : i64} {
  func.func @_linear_kernel(%arg0: i32, %arg1: memref<8x64xf32, #tpu.memory_space<vmem>>, %arg2: memref<64x10xf32, #tpu.memory_space<vmem>>, %arg3: memref<1x10xf32, #tpu.memory_space<vmem>>, %arg4: memref<8x10xf32, #tpu.memory_space<vmem>>) attributes {dimension_semantics = [#tpu.dimension_semantics<parallel>], iteration_bounds = array<i64: 1>, scalar_prefetch = 0 : i64, scratch_operands = 0 : i64, tpu.core_type = #tpu.core_type<tc>, window_params = [{transform_indices = @transform_0, window_bounds = array<i64: 8, 64>}, {pipeline_mode = #tpu.pipeline_mode<synchronous>, transform_indices = @transform_1, window_bounds = array<i64: 64, 10>}, {pipeline_mode = #tpu.pipeline_mode<synchronous>, transform_indices = @transform_2, window_bounds = array<i64: 1, 10>}, {transform_indices = @transform_3, window_bounds = array<i64: 8, 10>}]} {
    %c0 = arith.constant 0 : index
    %c0_0 = arith.constant 0 : index
    %0 = vector.load %arg1[%c0, %c0_0] : memref<8x64xf32, #tpu.memory_space<vmem>>, vector<8x64xf32>
    %c0_1 = arith.constant 0 : index
    %c0_2 = arith.constant 0 : index
    %1 = vector.load %arg2[%c0_1, %c0_2] : memref<64x10xf32, #tpu.memory_space<vmem>>, vector<64x10xf32>
    %cst = arith.constant dense<0.000000e+00> : vector<8x10xf32>
    %2 = tpu.matmul %0, %1, %cst {dimension_numbers = #tpu.dot_dimension_numbers<[1], [0], [0], [1], [0, 0, 1, 1], [], []>, precision = #tpu.contract_precision<fp32>} : vector<8x64xf32>, vector<64x10xf32>, vector<8x10xf32> -> vector<8x10xf32>
    %c0_3 = arith.constant 0 : index
    %c0_4 = arith.constant 0 : index
    %3 = vector.load %arg3[%c0_3, %c0_4] : memref<1x10xf32, #tpu.memory_space<vmem>>, vector<1x10xf32>
    %4 = vector.broadcast %3 : vector<1x10xf32> to vector<8x10xf32>
    %5 = arith.addf %2, %4 : vector<8x10xf32>
    %c0_5 = arith.constant 0 : index
    %c0_6 = arith.constant 0 : index
    %6 = vector.load %arg4[%c0_5, %c0_6] : memref<8x10xf32, #tpu.memory_space<vmem>>, vector<8x10xf32>
    tpu.vector_store %arg4[%c0_5, %c0_6], %5 {strides = array<i32>} : memref<8x10xf32, #tpu.memory_space<vmem>>, vector<8x10xf32>,
    return
  }
  func.func @transform_0(%arg0: i32) -> (i32, i32) {
    %c0_i32 = arith.constant 0 : i32
    %c0_i32_0 = arith.constant 0 : i32
    return %arg0, %c0_i32 : i32, i32
  }
  func.func @transform_1(%arg0: i32) -> (i32, i32) {
    %c0_i32 = arith.constant 0 : i32
    %c0_i32_0 = arith.constant 0 : i32
    %c0_i32_1 = arith.constant 0 : i32
    return %c0_i32, %c0_i32_0 : i32, i32
  }
  func.func @transform_2(%arg0: i32) -> (i32, i32) {
    %c0_i32 = arith.constant 0 : i32
    %c0_i32_0 = arith.constant 0 : i32
    %c0_i32_1 = arith.constant 0 : i32
    return %c0_i32, %c0_i32_0 : i32, i32
  }
  func.func @transform_3(%arg0: i32) -> (i32, i32) {
    %c0_i32 = arith.constant 0 : i32
    %c0_i32_0 = arith.constant 0 : i32
    return %arg0, %c0_i32 : i32, i32
  }
}

</mosaic_0001>

<bundles_post_ra>
// kernel: forward.1
= control target key start
LH: loop header
LB: loop body
LE: loop exit
PB: predicated region body
PF: predicated region fallthrough
CT: control target
= control target key end

     0   :  { %v867_v3 = vmov 0.0|0.0   ;;  %vm868_vm0 = vmmov 0   ;;  %v869_v11 = vmov 0.0   ;;  %s1040_s0 = inlined_call_operand.vmem [shape: f32[8,64], index: 0, kind: input, shape index: {}]   ;;  %s1041_s1 = inlined_call_operand.vmem [shape: f32[64,10], index: 1, kind: input, shape index: {}]   ;;  %s1042_s2 = inlined_call_operand.vmem [shape: f32[1,10], index: 2, kind: input, shape index: {}]   ;;  %s1043_s3 = inlined_call_operand.hbm [shape: f32[8,10], index: 3, kind: output, shape index: {}]  }
   0x1   :  { %v16_v0 = vld [vmem:[%s1041_s1] sm:$0xff]  ;;  %v17_v1 = vld [vmem:[%s1041_s1 + $0x8] sm:$0xff]  ;;  %v18_v2 = vld [vmem:[%s1041_s1 + $0x10] sm:$0xff]  ;;  %757 = vmatprep.subr.bf16.mxu1 %v867_v3  ;;  %793 = vmatprep.subr.bf16.mxu0 %v867_v3 }
   0x2   :  { %v36_v4 = vand.u32 4294901760, %v16_v0  ;;  %v39_v5 = vand.u32 4294901760, %v17_v1  ;;  %v19_v6 = vld [vmem:[%s1041_s1 + $0x18] sm:$0xff]  ;;  %v42_v7 = vand.u32 4294901760, %v18_v2  ;;  %v20_v8 = vld [vmem:[%s1041_s1 + $0x20] sm:$0xff]  ;;  %v21_v9 = vld [vmem:[%s1041_s1 + $0x28] sm:$0xff]  ;;  %659 = vmatprep.mubr.msk.f32.mxu1 %vm868_vm0, %v869_v11  ;;  %716 = vmatprep.mubr.msk.f32.mxu0 %vm868_vm0, %v869_v11 }
   0x3   :  { %v45_v10 = vand.u32 4294901760, %v19_v6  ;;  %v15_v15 = vld [vmem:[%s1040_s0] sm:$0xff] }
   0x4   :  { %v915_v12 = vpack.c.bf16 %v39_v5, %v36_v4  ;;  %v917_v13 = vsub.f32 %v16_v0, %v36_v4  ;;  %v919_v14 = vsub.f32 %v17_v1, %v39_v5 }
   0x5   :  { %8 = vsyncpa [#allocation3], 0  ;;  %v924_v16 = vsub.f32 %v18_v2, %v42_v7  ;;  %v48_v17 = vand.u32 4294901760, %v20_v8  ;;  %v51_v18 = vand.u32 4294901760, %v21_v9  ;;  %v22_v19 = vld [vmem:[%s1041_s1 + $0x30] sm:$0xff]  ;;  %v23_v20 = vld [vmem:[%s1041_s1 + $0x38] sm:$0xff]  ;;  %v934_v21 = vpack.c.bf16 %v45_v10, %v42_v7 }
   0x6   :  { %759 = vmatpush3.bf16.msra.mxu1 %v915_v12  ;;  %795 = vmatpush3.bf16.msra.mxu0 %v915_v12  ;;  %v936_v22 = vsub.f32 %v19_v6, %v45_v10  ;;  %vm31_vm1 = vcmask 523264   ;;  %v121_v24 = vand.u32 4294901760, %v917_v13  ;;  %v128_v25 = vand.u32 4294901760, %v919_v14  ;;  %v588_v10 = vld [vmem:[%s1042_s2] ss:$0 sm:$0xff]  ;;  %s870_s30 = smov [#allocation2]  }
   0x7   :  { %760 = vmatprep.subr.bf16.mxu1 %v867_v3  ;;  %796 = vmatprep.subr.bf16.mxu0 %v867_v3  ;;  %v33_v23 = vsel %vm31_vm1, %v15_v15, 0  ;;  %v54_v26 = vand.u32 4294901760, %v22_v19  ;;  %v57_v27 = vand.u32 4294901760, %v23_v20  ;;  %v944_v29 = vpack.c.bf16 %v51_v18, %v48_v17  ;;  %s580_s4 = sshll.u32 %s870_s30, 4  ;;  %s581_s4 = int_to_ptr.vmem [resolvable:$true] %s580_s4 }
   0x8   :  { %v942_v28 = vand.u32 4294901760, %v33_v23  ;;  %v946_v30 = vsub.f32 %v20_v8, %v48_v17  ;;  %v948_v31 = vsub.f32 %v21_v9, %v51_v18  ;;  %v135_v32 = vand.u32 4294901760, %v924_v16  ;;  %s843_s5 = scalar_lea.vmem %s581_s4, 128  ;;  %p848_p1 = scmp.lt.s32.totalorder %s581_s4, %s581_s4 }
   0x9   :  { %v122_v34 = vsub.f32 %v917_v13, %v121_v24  ;;  %v129_v35 = vsub.f32 %v919_v14, %v128_v25  ;;  %v142_v36 = vand.u32 4294901760, %v936_v22  ;;  %v961_v37 = vpack.c.bf16 %v57_v27, %v54_v26  ;;  %p844_p0 = scmp.ne.s32.totalorder %s581_s4, %s843_s5  ;;  %p849_p2 = scmp.lt.s32.totalorder %s843_s5, %s843_s5 }
   0xa   :  { %762 = vmatpush3.bf16.msra.mxu1 %v934_v21  ;;  %798 = vmatpush3.bf16.msra.mxu0 %v934_v21  ;;  %v954_v33 = vsub.f32 %v33_v23, %v942_v28  ;;  %v963_v38 = vsub.f32 %v22_v19, %v54_v26  ;;  %v966_v40 = vsub.f32 %v23_v20, %v57_v27  ;;  %v149_v42 = vand.u32 4294901760, %v946_v30 }
   0xb   :  { %763 = vmatprep.subr.bf16.mxu1 %v867_v3  ;;  %799 = vmatprep.subr.bf16.mxu0 %v867_v3  ;;  %v136_v41 = vsub.f32 %v924_v16, %v135_v32  ;;  %v156_v43 = vand.u32 4294901760, %v948_v31  ;;  %v123_v45 = vand.u32 4294901760, %v122_v34  ;;  %v130_v46 = vand.u32 4294901760, %v129_v35  ;;  %p850_p3 = por %p849_p2, %p848_p1 }
   0xc   :  { %v110_v39 = vand.u32 4294901760, %v954_v33  ;;  %v143_v47 = vsub.f32 %v936_v22, %v142_v36  ;;  %v806_v48 = vpack.c.bf16 %v128_v25, %v121_v24  ;;  %v150_v51 = vsub.f32 %v946_v30, %v149_v42 }
   0xd   :  { %v137_v50 = vand.u32 4294901760, %v136_v41  ;;  %v163_v52 = vand.u32 4294901760, %v963_v38  ;;  %v770_v53 = vpack.c.bf16 %v130_v46, %v123_v45  ;;  %v157_v55 = vsub.f32 %v948_v31, %v156_v43  ;;  %p851_p4 = pnand %p850_p3, %p844_p0 }
   0xe   :  { %765 = vmatpush3.bf16.msra.mxu1 %v944_v29  ;;  %801 = vmatpush3.bf16.msra.mxu0 %v944_v29  ;;  %v111_v44 = vsub.f32 %v954_v33, %v110_v39  ;;  %v144_v54 = vand.u32 4294901760, %v143_v47  ;;  %v170_v56 = vand.u32 4294901760, %v966_v40  ;;  %v809_v57 = vpack.c.bf16 %v142_v36, %v135_v32 }
   0xf   :  { %766 = vmatprep.subr.bf16.mxu1 %v867_v3  ;;  %802 = vmatprep.subr.bf16.mxu0 %v867_v3  ;;  %v164_v58 = vsub.f32 %v963_v38, %v163_v52  ;;  %v151_v60 = vand.u32 4294901760, %v150_v51  ;;  %v158_v61 = vand.u32 4294901760, %v157_v55  ;;  %v812_v0 = vpack.c.bf16 %v156_v43, %v149_v42 }
  0x10   :  { %v112_v49 = vand.u32 4294901760, %v111_v44  ;;  %v773_v59 = vpack.c.bf16 %v144_v54, %v137_v50  ;;  %v171_v62 = vsub.f32 %v966_v40, %v170_v56  ;;  %v815_v5 = vpack.c.bf16 %v170_v56, %v163_v52 }
  0x11   :  { %v776_v63 = vpack.c.bf16 %v158_v61, %v151_v60  ;;  %v165_v1 = vand.u32 4294901760, %v164_v58  ;;  %v782_v6 = vpack.c.bf16 %v919_v14, %v917_v13  ;;  %v785_v7 = vpack.c.bf16 %v936_v22, %v924_v16 }
  0x12   :  { %768 = vmatpush3.bf16.msra.mxu1 %v961_v37  ;;  %804 = vmatpush3.bf16.msra.mxu0 %v961_v37  ;;  %v172_v2 = vand.u32 4294901760, %v171_v62  ;;  %v788_v8 = vpack.c.bf16 %v948_v31, %v946_v30  ;;  %v791_v9 = vpack.c.bf16 %v966_v40, %v963_v38  ;;  %vm572_vm2 = vcmask 80896  }
  0x13   :  { %769 = vmatprep.subr.bf16.mxu1 %v867_v3  ;;  %805 = vmatprep.subr.bf16.mxu0 %v867_v3 }
  0x14   :  { %v779_v4 = vpack.c.bf16 %v172_v2, %v165_v1 }
  0x15   :  { %660 = vmatmul.mubr.f32.vlgmr.msra.gmra.mrb[0].mxu1 %v112_v49  ;;  %717 = vmatmul.mubr.f32.vlgmr.msra.gmra.mrb[0].mxu0 %v110_v39 }
  0x16   :  { %771 = vmatpush3.bf16.msra.mxu1 %v770_v53  ;;  %807 = vmatpush3.bf16.msra.mxu0 %v806_v48 }
  0x17   :  { %772 = vmatprep.subr.bf16.mxu1 %v867_v3  ;;  %808 = vmatprep.subr.bf16.mxu0 %v867_v3 }
  0x18   :  { %678 = vmatprep.mubr.msk.f32.mxu1 %vm868_vm0, %v869_v11  ;;  %735 = vmatprep.mubr.msk.f32.mxu0 %vm868_vm0, %v869_v11 }
  0x1a   :  { %774 = vmatpush3.bf16.msra.mxu1 %v773_v59  ;;  %810 = vmatpush3.bf16.msra.mxu0 %v809_v57 }
  0x1b   :  { %775 = vmatprep.subr.bf16.mxu1 %v867_v3  ;;  %811 = vmatprep.subr.bf16.mxu0 %v867_v3 }
  0x1e   :  { %777 = vmatpush3.bf16.msra.mxu1 %v776_v63  ;;  %813 = vmatpush3.bf16.msra.mxu0 %v812_v0 }
  0x1f   :  { %778 = vmatprep.subr.bf16.mxu1 %v867_v3  ;;  %814 = vmatprep.subr.bf16.mxu0 %v867_v3 }
  0x22   :  { %780 = vmatpush3.bf16.msra.mxu1 %v779_v4  ;;  %816 = vmatpush3.bf16.msra.mxu0 %v815_v5 }
  0x23   :  { %781 = vmatprep.subr.bf16.mxu1 %v867_v3  ;;  %817 = vmatprep.subr.bf16.mxu0 %v867_v3 }
  0x25   :  { %679 = vmatmul.mubr.f32.vlgmr.msra.gmra.mrb[0].mxu1 %v942_v28  ;;  %736 = vmatmul.mubr.f32.vlgmr.msra.gmra.mrb[0].mxu0 %v942_v28 }
  0x26   :  { %783 = vmatpush3.bf16.msra.mxu1 %v782_v6  ;;  %819 = vmatpush3.bf16.msra.mxu0 %v915_v12 }
  0x27   :  { %784 = vmatprep.subr.bf16.mxu1 %v867_v3  ;;  %820 = vmatprep.subr.bf16.mxu0 %v867_v3 }
  0x28   :  { %697 = vmatprep.mubr.msk.f32.mxu1 %vm868_vm0, %v869_v11  ;;  %754 = vmatprep.mubr.msk.f32.mxu0 %vm868_vm0, %v869_v11 }
  0x2a   :  { %786 = vmatpush3.bf16.msra.mxu1 %v785_v7  ;;  %822 = vmatpush3.bf16.msra.mxu0 %v934_v21 }
  0x2b   :  { %787 = vmatprep.subr.bf16.mxu1 %v867_v3  ;;  %823 = vmatprep.subr.bf16.mxu0 %v867_v3 }
  0x2e   :  { %789 = vmatpush3.bf16.msra.mxu1 %v788_v8  ;;  %825 = vmatpush3.bf16.msra.mxu0 %v944_v29 }
  0x2f   :  { %790 = vmatprep.subr.bf16.mxu1 %v867_v3  ;;  %826 = vmatprep.subr.bf16.mxu0 %v867_v3 }
  0x32   :  { %792 = vmatpush3.bf16.msra.mxu1 %v791_v9  ;;  %828 = vmatpush3.bf16.msra.mxu0 %v961_v37 }
  0x35   :  { %698 = vmatmul.mubr.f32.vlgmr.msra.gmra.mrb[0].mxu1 %v954_v33  ;;  %755 = vmatmul.mubr.f32.vlgmr.msra.gmra.mrb[0].mxu0 %v942_v28 }
 0x108   :  { %v313_v11 = vpop.f32.mrb[0].mxu1  ;;  %v568_v12 = vpop.f32.mrb[0].mxu0 }
 0x109   :  { %v829_v13 = vadd.f32 %v588_v10, %v313_v11  ;;  %v699_v14 = vpop.f32.mrb[1].mxu1  ;;  %v756_v15 = vpop.f32.mrb[1].mxu0 }
 0x10b   :  { %v830_v3 = vadd.f32 %v829_v13, %v568_v12 }
 0x10d   :  { %573 = vst.msk [vmem:[#allocation2] sm:$0xff] %vm572_vm2, %v830_v3 }
 0x10e   :  { %854 = shalt.err (!%p851_p4)
}
 0x10f   :  { %s855_s7 = scalar_lea.hbm %s1043_s3, 128 }
 0x110   :  { %p856_p5 = scmp.ne.s32.totalorder %s1043_s3, %s855_s7  ;;  %p859_p6 = scmp.lt.u32.totalorder %s855_s7, %s1043_s3 }
 0x112   :  { %p861_p7 = pnand %p859_p6, %p856_p5 }
 0x114   :  { %864 = shalt.err (!%p861_p7)
}
 0x115   :  { %583 = dma.vmem_to_hbm [thread:$0]  %s581_s4, 128, %s1043_s3, [#allocation3]  }
 0x116   :  { %865 = dma.done.wait [#allocation3], 128  }
 0x117   :  { %866 = vsyncadd [#allocation3], 4294967168 }
 0x118   :  { %587 = vsyncpa [#allocation3], 1 }

</bundles_post_ra>
